<compile_context>
chip_gen: v7x
topology: tpu7x:2x2x1
jax: 0.10.0
libtpu: 0.0.40
codegen_flags: <defaults>
</compile_context>

<pallas_src>
import functools

import jax
import jax.numpy as jnp
from jax.experimental import pallas as pl
from jax.experimental.pallas import tpu as pltpu


def _round_up(x, m):
    return (x + m - 1) // m * m


def _choose_tiling(B, C, hw, itemsize):
    """Pick (batch_tile, lane_tile, n_lane_blocks, vmem_limit_bytes)."""
    # Bytes that scale with the number of (batch, lane) columns in flight:
    # double-buffered input + double-buffered output tiles, plus the f32
    # matmul/epilogue temporaries the kernel materializes.
    per_col = 4 * C * itemsize + 8 * C
    # Resident blocks (weight double-buffer counted at f32 width to be safe,
    # bias double-buffer, slack for compiler internal scratch).
    resident = 2 * C * C * 4 + 2 * C * 4 + 4096
    budget = 24 * 1024 * 1024            # ~25% headroom under the 32 MiB scoped limit
    max_cols = max(128, (budget - resident) // per_col)

    hw128 = _round_up(hw, 128)
    # Lane tile: multiple of 128, capped at 2048 (larger tiles only add VMEM
    # pressure, esp. on v7x's 64 MiB/TC), bounded by the VMEM column budget.
    tn = int(min(2048, hw128, max(128, (max_cols // 128) * 128)))
    nb = int(pl.cdiv(hw, tn))

    # Guarantee >= 2 grid steps (two v7x TensorCores) when possible.
    if B * nb < 2 and hw > 128:
        tn = int(_round_up(pl.cdiv(hw, 2), 128))
        nb = int(pl.cdiv(hw, tn))

    # Fold batch samples into one grid step when the spatial tile is tiny
    # (late MBConv stages): amortizes per-step overhead, keeps DMAs big,
    # while still leaving >= 2 total steps and respecting the VMEM budget.
    bt = 1
    target_cols = 2048
    if nb == 1 and tn < target_cols and B > 1:
        bt_cap = int(max(1, min(max_cols // tn, target_cols // tn, 8, B)))
        min_steps = min(2, B * nb)
        for cand in range(bt_cap, 0, -1):
            if B % cand == 0 and (B // cand) * nb >= min_steps:
                bt = cand
                break

    est = resident + per_col * bt * tn
    vmem_limit = int(min(48 * 1024 * 1024, max(32 * 1024 * 1024, est * 5 // 4)))
    return bt, tn, nb, vmem_limit


def _mbconv_residual_kernel(keep_ref, x_ref, wt_ref, b_ref, o_ref, *,
                            small_c, apply_scale, inv_keep_prob, bt):
    """One (bt, C, TN) tile:  out = dropsample(w_T @ x + b) + x.

    keep_ref: (B,) int32 in SMEM (scalar prefetch) -- per-sample 0/1 keep mask
    x_ref   : (bt, C, TN) input tile -- channels on sublanes, H*W on lanes
    wt_ref  : (C, C)  transposed 1x1-conv weight (out_ch, in_ch), resident
    b_ref   : (C, 1)  bias column (f32), resident
    o_ref   : (bt, C, TN) output tile (lane-dense stores)
    """
    wt = wt_ref[...]
    bias = b_ref[...]                               # (C, 1) f32

    for bi in range(bt):                            # static unroll; bt <= 8
        x = x_ref[bi]                               # (C, TN)

        if small_c:
            # Tiny channel count (C <= 4): channel mix as C broadcast FMAs on
            # the VPU; wrapper passes the weight as f32 on this path.
            xf = x.astype(jnp.float32)
            acc = jnp.zeros(xf.shape, dtype=jnp.float32)
            for i in range(xf.shape[0]):
                acc = acc + wt[:, i:i + 1] * xf[i:i + 1, :]
            y = acc + bias
        else:
            # MXU path: (C, C) @ (C, TN), lane-dense on TN, f32 accumulation.
            y = jnp.dot(wt, x, preferred_element_type=jnp.float32) + bias

        if apply_scale:
            # Training-time Dropsample: per-sample 0/1 keep scaled by 1/(1-p).
            gb = pl.program_id(0) * bt + bi
            y = y * (keep_ref[gb].astype(jnp.float32) * inv_keep_prob)

        # Fused residual add; single lane-dense store per sample.
        o_ref[bi] = (y + x.astype(jnp.float32)).astype(o_ref.dtype)


def mbconv_residual(x_nchw, w, b, *, prob=0.0, training=False, rng_key=None):
    """Fused MBConvResidual forward: dropsample(fn(x)) + x, fn = 1x1 conv (C->C).

    Args:
      x_nchw: [B, C, H, W] input (PyTorch NCHW layout, f32 or bf16)
      w:      [C, C] 1x1-conv weight, (in_ch, out_ch)
      b:      [C]    bias
      prob, training, rng_key: Dropsample config (identity when prob==0 or eval).
    Returns:
      [B, C, H, W], same dtype as x.
    """
    B, C, H, W = x_nchw.shape
    hw = H * W
    dtype = x_nchw.dtype
    itemsize = jnp.dtype(dtype).itemsize
    small_c = C <= 4

    bt, tn, nb, vmem_limit = _choose_tiling(B, C, hw, itemsize)

    # No host-side padding: ragged hw is handled by Pallas partial blocks
    # (reads past the end are garbage lanes that never mix across lanes and
    # are never written back).
    x3 = x_nchw.reshape(B, C, hw)

    # Pre-transform the (tiny) parameters outside the kernel: no per-step
    # cast/broadcast work on the resident blocks.
    w_t = jnp.transpose(w).astype(jnp.float32 if small_c else dtype)   # (out, in)
    b_col = b.reshape(C, 1).astype(jnp.float32)

    apply_scale = bool(training) and float(prob) > 0.0
    if apply_scale:
        if rng_key is None:
            raise ValueError("rng_key is required for training-time Dropsample")
        keep = (jax.random.uniform(rng_key, (B,)) > prob).astype(jnp.int32)
        inv_keep_prob = 1.0 / (1.0 - float(prob))
    else:
        keep = jnp.ones((B,), jnp.int32)
        inv_keep_prob = 1.0

    grid = (B // bt, nb)
    kernel = functools.partial(
        _mbconv_residual_kernel, small_c=small_c, apply_scale=apply_scale,
        inv_keep_prob=inv_keep_prob, bt=bt)

    flops = 2 * B * C * C * hw + 4 * B * C * hw
    bytes_accessed = 2 * B * C * hw * itemsize + C * C * itemsize + (C + B) * 4

    out3 = pl.pallas_call(
        kernel,
        out_shape=jax.ShapeDtypeStruct((B, C, hw), dtype),
        grid_spec=pltpu.PrefetchScalarGridSpec(
            num_scalar_prefetch=1,                 # keep mask -> SMEM
            grid=grid,
            in_specs=[
                pl.BlockSpec((bt, C, tn), lambda bi, ni, keep: (bi, 0, ni)),  # x tile
                pl.BlockSpec((C, C), lambda bi, ni, keep: (0, 0)),            # weight (resident)
                pl.BlockSpec((C, 1), lambda bi, ni, keep: (0, 0)),            # bias   (resident)
            ],
            out_specs=pl.BlockSpec((bt, C, tn), lambda bi, ni, keep: (bi, 0, ni)),
        ),
        compiler_params=pltpu.CompilerParams(
            dimension_semantics=("parallel", "parallel"),
            vmem_limit_bytes=vmem_limit,
        ),
        cost_estimate=pl.CostEstimate(
            flops=int(flops), transcendentals=0, bytes_accessed=int(bytes_accessed)),
    )(keep, x3, w_t, b_col)

    return out3.reshape(B, C, H, W)


if __name__ == "__main__":
    key = jax.random.PRNGKey(0)

    def reference(x, w, b, scale=None):
        y = jnp.einsum('bihw,io->bohw', x.astype(jnp.float32), w.astype(jnp.float32))
        y = y + b.astype(jnp.float32)[None, :, None, None]
        if scale is not None:
            y = y * scale[:, None, None, None]
        return y + x.astype(jnp.float32)

    # 1) Small-C VPU path, f32, lane-aligned spatial size.
    k1, k2, k3, key = jax.random.split(key, 4)
    B, C, H, W = 2, 4, 16, 16
    x = jax.random.normal(k1, (B, C, H, W), jnp.float32)
    w = jax.random.normal(k2, (C, C), jnp.float32) * 0.1
    b = jax.random.normal(k3, (C,), jnp.float32) * 0.1
    out = jax.block_until_ready(mbconv_residual(x, w, b))
    ref = reference(x, w, b)
    assert out.shape == (B, C, H, W)
    assert jnp.allclose(out.astype(jnp.float32), ref, atol=1e-5, rtol=1e-5), "mismatch (test 1)"

    # 2) MXU path, ragged spatial size (exercises partial-block masking, no pad/slice).
    k1, k2, k3, key = jax.random.split(key, 4)
    B2, C2, H2, W2 = 3, 32, 9, 13                       # H*W = 117
    x2 = jax.random.normal(k1, (B2, C2, H2, W2), jnp.float32)
    w2 = jax.random.normal(k2, (C2, C2), jnp.float32) * 0.1
    b2 = jax.random.normal(k3, (C2,), jnp.float32) * 0.1
    out2 = jax.block_until_ready(mbconv_residual(x2, w2, b2))
    ref2 = reference(x2, w2, b2)
    assert jnp.allclose(out2.astype(jnp.float32), ref2, atol=2e-2, rtol=2e-2), "mismatch (test 2)"

    # 3) bf16 activations/weights (MXU path, f32 accumulation).
    k1, k2, k3, key = jax.random.split(key, 4)
    B3, C3, H3, W3 = 2, 32, 16, 16
    x3 = jax.random.normal(k1, (B3, C3, H3, W3), jnp.float32).astype(jnp.bfloat16)
    w3 = (jax.random.normal(k2, (C3, C3), jnp.float32) * 0.1).astype(jnp.bfloat16)
    b3 = (jax.random.normal(k3, (C3,), jnp.float32) * 0.1).astype(jnp.bfloat16)
    out3 = jax.block_until_ready(mbconv_residual(x3, w3, b3))
    ref3 = reference(x3, w3, b3)
    assert jnp.allclose(out3.astype(jnp.float32), ref3, atol=5e-2, rtol=5e-2), "mismatch (test 3)"

    # 4) Training-time Dropsample (per-sample keep mask scaled by 1/(1-p)).
    kd, key = jax.random.split(key, 2)
    prob = 0.5
    out4 = jax.block_until_ready(
        mbconv_residual(x, w, b, prob=prob, training=True, rng_key=kd))
    keep = (jax.random.uniform(kd, (B,)) > prob).astype(jnp.float32)
    ref4 = reference(x, w, b, scale=keep / (1.0 - prob))
    assert jnp.allclose(out4.astype(jnp.float32), ref4, atol=1e-5, rtol=1e-5), "mismatch (test 4)"

    print("KERNEL_OK")
</pallas_src>

<mosaic_0001>
module attributes {stable_mosaic.version = 11 : i64} {
  func.func @_mbconv_residual_kernel(%arg0: i32, %arg1: i32, %arg2: memref<2xi32, #tpu.memory_space<smem>>, %arg3: memref<1x4x256xf32, #tpu.memory_space<vmem>>, %arg4: memref<4x4xf32, #tpu.memory_space<vmem>>, %arg5: memref<4x1xf32, #tpu.memory_space<vmem>>, %arg6: memref<1x4x256xf32, #tpu.memory_space<vmem>>) attributes {dimension_semantics = [#tpu.dimension_semantics<parallel>, #tpu.dimension_semantics<parallel>], iteration_bounds = array<i64: 2, 1>, scalar_prefetch = 1 : i64, scratch_operands = 0 : i64, tpu.core_type = #tpu.core_type<tc>, window_params = [{transform_indices = @transform_0, window_bounds = array<i64: 1, 4, 256>}, {pipeline_mode = #tpu.pipeline_mode<synchronous>, transform_indices = @transform_1, window_bounds = array<i64: 4, 4>}, {pipeline_mode = #tpu.pipeline_mode<synchronous>, transform_indices = @transform_2, window_bounds = array<i64: 4, 1>}, {transform_indices = @transform_3, window_bounds = array<i64: 1, 4, 256>}]} {
    %c0 = arith.constant 0 : index
    %c0_0 = arith.constant 0 : index
    %0 = vector.load %arg4[%c0, %c0_0] : memref<4x4xf32, #tpu.memory_space<vmem>>, vector<4x4xf32>
    %c0_1 = arith.constant 0 : index
    %c0_2 = arith.constant 0 : index
    %1 = vector.load %arg5[%c0_1, %c0_2] : memref<4x1xf32, #tpu.memory_space<vmem>>, vector<4x1xf32>
    %c0_3 = arith.constant 0 : index
    %c0_4 = arith.constant 0 : index
    %c0_5 = arith.constant 0 : index
    %2 = vector.load %arg3[%c0_3, %c0_4, %c0_5] : memref<1x4x256xf32, #tpu.memory_space<vmem>>, vector<1x4x256xf32>
    %3 = vector.shape_cast %2 : vector<1x4x256xf32> to vector<4x256xf32>
    %cst = arith.constant 0.000000e+00 : f32
    %4 = vector.broadcast %cst : f32 to vector<4x256xf32>
    %5 = vector.extract_strided_slice %0 {offsets = [0, 0], sizes = [4, 1], strides = [1, 1]} : vector<4x4xf32> to vector<4x1xf32>
    %6 = vector.extract_strided_slice %3 {offsets = [0, 0], sizes = [1, 256], strides = [1, 1]} : vector<4x256xf32> to vector<1x256xf32>
    %7 = vector.broadcast %5 : vector<4x1xf32> to vector<4x256xf32>
    %8 = vector.broadcast %6 : vector<1x256xf32> to vector<4x256xf32>
    %9 = arith.mulf %7, %8 : vector<4x256xf32>
    %10 = arith.addf %4, %9 : vector<4x256xf32>
    %11 = vector.extract_strided_slice %0 {offsets = [0, 1], sizes = [4, 1], strides = [1, 1]} : vector<4x4xf32> to vector<4x1xf32>
    %12 = vector.extract_strided_slice %3 {offsets = [1, 0], sizes = [1, 256], strides = [1, 1]} : vector<4x256xf32> to vector<1x256xf32>
    %13 = vector.broadcast %11 : vector<4x1xf32> to vector<4x256xf32>
    %14 = vector.broadcast %12 : vector<1x256xf32> to vector<4x256xf32>
    %15 = arith.mulf %13, %14 : vector<4x256xf32>
    %16 = arith.addf %10, %15 : vector<4x256xf32>
    %17 = vector.extract_strided_slice %0 {offsets = [0, 2], sizes = [4, 1], strides = [1, 1]} : vector<4x4xf32> to vector<4x1xf32>
    %18 = vector.extract_strided_slice %3 {offsets = [2, 0], sizes = [1, 256], strides = [1, 1]} : vector<4x256xf32> to vector<1x256xf32>
    %19 = vector.broadcast %17 : vector<4x1xf32> to vector<4x256xf32>
    %20 = vector.broadcast %18 : vector<1x256xf32> to vector<4x256xf32>
    %21 = arith.mulf %19, %20 : vector<4x256xf32>
    %22 = arith.addf %16, %21 : vector<4x256xf32>
    %23 = vector.extract_strided_slice %0 {offsets = [0, 3], sizes = [4, 1], strides = [1, 1]} : vector<4x4xf32> to vector<4x1xf32>
    %24 = vector.extract_strided_slice %3 {offsets = [3, 0], sizes = [1, 256], strides = [1, 1]} : vector<4x256xf32> to vector<1x256xf32>
    %25 = vector.broadcast %23 : vector<4x1xf32> to vector<4x256xf32>
    %26 = vector.broadcast %24 : vector<1x256xf32> to vector<4x256xf32>
    %27 = arith.mulf %25, %26 : vector<4x256xf32>
    %28 = arith.addf %22, %27 : vector<4x256xf32>
    %29 = vector.broadcast %1 : vector<4x1xf32> to vector<4x256xf32>
    %30 = arith.addf %28, %29 : vector<4x256xf32>
    %31 = arith.addf %30, %3 : vector<4x256xf32>
    %c0_6 = arith.constant 0 : index
    %c0_7 = arith.constant 0 : index
    %c0_8 = arith.constant 0 : index
    %32 = vector.load %arg6[%c0_6, %c0_7, %c0_8] : memref<1x4x256xf32, #tpu.memory_space<vmem>>, vector<1x4x256xf32>
    %33 = vector.shape_cast %32 : vector<1x4x256xf32> to vector<4x256xf32>
    %34 = vector.shape_cast %31 : vector<4x256xf32> to vector<1x4x256xf32>
    tpu.vector_store %arg6[%c0_6, %c0_7, %c0_8], %34 {strides = array<i32>} : memref<1x4x256xf32, #tpu.memory_space<vmem>>, vector<1x4x256xf32>,
    return
  }
  func.func @transform_0(%arg0: i32, %arg1: i32, %arg2: memref<2xi32, #tpu.memory_space<smem>>) -> (i32, i32, i32) {
    %c0_i32 = arith.constant 0 : i32
    %c0_i32_0 = arith.constant 0 : i32
    return %arg0, %c0_i32, %arg1 : i32, i32, i32
  }
  func.func @transform_1(%arg0: i32, %arg1: i32, %arg2: memref<2xi32, #tpu.memory_space<smem>>) -> (i32, i32) {
    %c0_i32 = arith.constant 0 : i32
    %c0_i32_0 = arith.constant 0 : i32
    %c0_i32_1 = arith.constant 0 : i32
    return %c0_i32, %c0_i32_0 : i32, i32
  }
  func.func @transform_2(%arg0: i32, %arg1: i32, %arg2: memref<2xi32, #tpu.memory_space<smem>>) -> (i32, i32) {
    %c0_i32 = arith.constant 0 : i32
    %c0_i32_0 = arith.constant 0 : i32
    %c0_i32_1 = arith.constant 0 : i32
    return %c0_i32, %c0_i32_0 : i32, i32
  }
  func.func @transform_3(%arg0: i32, %arg1: i32, %arg2: memref<2xi32, #tpu.memory_space<smem>>) -> (i32, i32, i32) {
    %c0_i32 = arith.constant 0 : i32
    %c0_i32_0 = arith.constant 0 : i32
    return %arg0, %c0_i32, %arg1 : i32, i32, i32
  }
}

</mosaic_0001>

<bundles_post_ra>
// kernel: tpu_custom_call.1
= control target key start
LH: loop header
LB: loop body
LE: loop exit
PB: predicated region body
PF: predicated region fallthrough
CT: control target
= control target key end

     0   :  { %s876_s0 = inlined_call_operand.vmem [shape: s32[2], index: 0, kind: input, shape index: {}]   ;;  %s877_s1 = inlined_call_operand.hbm [shape: f32[2,4,256], index: 1, kind: input, shape index: {}]   ;;  %s878_s2 = inlined_call_operand.vmem [shape: f32[4,4], index: 2, kind: input, shape index: {}]   ;;  %s879_s3 = inlined_call_operand.vmem [shape: f32[4,1], index: 3, kind: input, shape index: {}]   ;;  %s880_s4 = inlined_call_operand.hbm [shape: f32[2,4,256], index: 4, kind: output, shape index: {}]  }
   0x1   :  { %s9_s17 = sshll.u32 %s876_s0, 4  ;;  %s10_s17 = int_to_ptr.vmem [resolvable:$true] %s9_s17 }
   0x2   :  { %s531_s18 = scalar_lea.vmem %s10_s17, 16  ;;  %p536_p1 = scmp.lt.s32.totalorder %s10_s17, %s10_s17 }
   0x3   :  { %p532_p0 = scmp.ne.s32.totalorder %s10_s17, %s531_s18  ;;  %p537_p2 = scmp.lt.s32.totalorder %s531_s18, %s531_s18 }
   0x5   :  { %p538_p3 = por %p537_p2, %p536_p1 }
   0x7   :  { %p539_p4 = pnand %p538_p3, %p532_p0 }
   0x9   :  { %542 = shalt.err (!%p539_p4)  }
   0xa   :  { %s659_s19 = smov [#allocation3]  }
   0xb   :  { %12 = dma.vmem_to_smem %s10_s17, 16, %s659_s19, [#allocation2] }
   0xc   :  { %625 = dma.done.wait [#allocation2], 16 }
   0xd   :  { %626 = vsyncadd [#allocation2], 4294967280 }
   0xe   :  { %14 = sfence }
   0xf   :  { %15 = vsyncpa [#allocation5], 0 }
  0x10   :  { %17 = vsyncpa [#allocation5 + $0x1], 0 }
  0x11   :  { %18 = vsyncpa [#allocation6], 0 }
  0x12   :  { %20 = vsyncpa [#allocation6 + $0x1], 0  ;;  %s694_s20 = smov 0   ;;  %s696_s0 = smov 0  }
  0x13   :  { %s698_s21 = smov 0   ;;  %s700_s22 = smov 0  }
  0x14   :  { %s702_s23 = smov 0   ;;  %s704_s24 = smov 0  }
  0x15 LB: > { %s440_s25 = sadd.s32 4294967295, %s657_s24   ;;  %s441_s26 = sadd.s32 4294967294, %s657_s24   ;;  %s657_s24 = sphi %s704_s24, %s26_s24   ;;  %s653_s23 = sphi %s702_s23, %s896_s23   ;;  %s649_s22 = sphi %s700_s22, %s895_s22   ;;  %s645_s21 = sphi %s698_s21, %s894_s21   ;;  %s641_s0 = sphi %s696_s0, %s893_s0   ;;  %s637_s20 = sphi %s694_s20, %s892_s20  }
  0x16   : > { %s38_s27 = sadd.s32 1, %s653_s23  ;;  %s47_s28 = sadd.s32 1, %s645_s21 }
  0x17   : > { %p40_p5 = scmp.ge.s32.totalorder %s38_s27, 2  ;;  %p54_p6 = scmp.ne.s32.totalorder %s645_s21, %s641_s0 }
  0x18   : > { %p55_p7 = scmp.eq.s32.totalorder %s657_s24, 0  ;;  %p60_p8 = scmp.ne.s32.totalorder %s641_s0, %s637_s20 }
  0x19   : > { %s898_s27 = smov (%p40_p5, %s38_s27), 0  ;;  %p61_p10 = scmp.eq.s32.totalorder %s440_s25, 0 }
  0x1a   : > { %p735_p9 = por %p55_p7, %p54_p6  ;;  %s42_s30 = ssub.s32 %s653_s23, %s898_s27 }
  0x1b   : > { %p128_p11 = scmp.eq.s32.totalorder %s440_s25, 1  ;;  %p45_p12 = scmp.eq.s32.totalorder %s42_s30, 0 }
  0x1c   : > { %p741_p13 = por %p61_p10, %p60_p8  ;;  %p134_p1 = scmp.eq.s32.totalorder %s441_s26, 1 }
  0x1d   : > { %p745_p0 = por %p128_p11, %p54_p6  ;;  %p469_p4 = scmp.lt.s32.totalorder %s657_s24, 2 }
  0x1e   : > { %s750_s7 = scalar_select %p45_p12, %s645_s21, %s47_s28  }
  0x1f   : > { %s884_s6 = scalar_select %p745_p0, 1, 0 }
  0x20   : > { %p752_p2 = por %p134_p1, %p60_p8  ;;  %s160_s9 = sand.u32 1, %s645_s21  }
  0x21   : > { %s444_s10 = sshll.u32 %s160_s9, 3  ;;  %s455_s11 = sshll.u32 %s653_s23, 7 }
  0x22   : > { %s885_s8 = scalar_select %p752_p2, 1, 0 }
  0x23   : > { %s763_s14 = scalar_lea.hbm %s877_s1, %s455_s11  ;;  %s164_s15 = scalar_lea.vmem [#allocation4], %s444_s10 }
  0x24   : > { %s174_s16 = sshll.u32 %s164_s15, 4  ;;  %p769_p5 = pnand %p469_p4, %p735_p9  ;;  %s765_s16 = int_to_ptr.vmem [resolvable:$true] %s174_s16 }
  0x25   : > { %s161_s18 = scalar_lea.sflag [#allocation5], %s160_s9  ;;  %s543_s19 = scalar_lea.hbm %s763_s14, 128 }
  0x26   : > { %p544_p8 = scmp.ne.s32.totalorder %s763_s14, %s543_s19  ;;  %p545_p10 = pneg %p769_p5 }
  0x27   : > { %s548_s28 = scalar_lea.hbm %s877_s1, 256  ;;  %p549_p9 = scmp.lt.u32.totalorder %s763_s14, %s877_s1 }
  0x28   : > { %p546_p11 = pnand %p545_p10, %p544_p8  ;;  %p550_p1 = scmp.lt.u32.totalorder %s548_s28, %s543_s19 }
  0x29   : > { %p552_p3 = scmp.lt.u32.totalorder %s543_s19, %s763_s14 }
  0x2a   : > { %p547_p12 = pneg %p546_p11  ;;  %p551_p4 = por %p550_p1, %p549_p9 }
  0x2c   : > { %p553_p6 = por %p552_p3, %p551_p4 }
  0x2e   : > { %p554_p7 = pnand %p553_p6, %p547_p12 }
  0x30   : > { %557 = shalt.err (!%p554_p7)
}
  0x31   : > { %s558_s9 = scalar_lea.vmem %s765_s16, 128  ;;  %s660_s10 = smov [#allocation4]  }
  0x32   : > { %p559_p8 = scmp.ne.s32.totalorder %s765_s16, %s558_s9  ;;  %s563_s11 = sshll.u32 %s660_s10, 4  ;;  %s564_s11 = int_to_ptr.vmem [resolvable:$false] %s563_s11 }
  0x33   : > { %s565_s12 = scalar_lea.vmem %s564_s11, 256  ;;  %p566_p0 = scmp.lt.s32.totalorder %s765_s16, %s564_s11 }
  0x34   : > { %p561_p11 = pnand %p559_p8, %p545_p10  ;;  %p567_p9 = scmp.lt.s32.totalorder %s565_s12, %s558_s9 }
  0x36   : > { %p562_p2 = pneg %p561_p11  ;;  %p568_p1 = por %p567_p9, %p566_p0 }
  0x38   : > { %p569_p3 = pnand %p568_p1, %p562_p2 }
  0x3a   : > { %572 = shalt.err (!%p569_p3)
}
  0x3b   : > { %464 = dma.hbm_to_vmem [thread:$0]  (!%p769_p5), %s763_s14, 128, %s765_s16, %s161_s18  }
  0x3c   : > { %p887_p6 = scmp.lt.s32.totalorder %s657_s24, 3  ;;  %p888_p7 = scmp.ge.s32.totalorder %s657_s24, 1 }
  0x3e   : > { %p180_p10 = pnand %p888_p7, %p887_p6 }
  0x3f   : > { %s805_s13 = sand.u32 (!%p180_p10), 1, %s641_s0  }
  0x40   : > { %183 = sbr.rel (%p180_p10) target bundleno = 235 (0xeb), region = 32  ;;  %s448_s15 = sshll.u32 (!%p180_p10), %s805_s13, 3 }
  0x41   : > { %s186_s19 = scalar_lea.sflag (!%p180_p10), [#allocation5], %s805_s13  ;;  %s189_s17 = scalar_lea.vmem (!%p180_p10), [#allocation4], %s448_s15 }
  0x47   : > { %628 = dma.done.wait (%p741_p13), %s186_s19, 128  }
  0x48   : > { %630 = vsyncadd (%p741_p13), %s186_s19, 4294967168  ;;  %v661_v0 = vmov 0   ;;  %v662_v1 = vmov 2   ;;  %v214_v2 = vld [vmem:[%s878_s2] sm:$0xf]  ;;  %v663_v3 = vmov 1   ;;  %v223_v6 = vlaneseq }
  0x49   : > { %524 = vset.pattern.permute.xlu0 %v661_v0  ;;  %526 = vset.pattern.permute.xlu1 %v662_v1  ;;  %v664_v4 = vmov 3   ;;  %v215_v5 = vld [vmem:[%s879_s3] sm:$0xf]  ;;  %s456_s5 = sshll.u32 %s649_s22, 7  ;;  %s211_s26 = scalar_lea.vmem [#allocation7], %s448_s15 }
  0x4a   : > { %219 = vperm.xlu0 %524, %v214_v2   ;;  %272 = vperm.xlu1 %526, %v214_v2   ;;  %v224_v7 = vshrl.u32 %v223_v6, 7  ;;  %v216_v12 = vld [vmem:[%s189_s17] sm:$0xff]  ;;  %s356_s28 = sshll.u32 %s211_s26, 4  ;;  %s827_s9 = scalar_lea.hbm %s880_s4, %s456_s5  ;;  %s829_s28 = int_to_ptr.vmem [resolvable:$true] %s356_s28 }
  0x4b   : > { %v330_v50 = vcombine.high %v216_v12, %v216_v12  ;;  %s340_s10 = scalar_lea.sflag [#allocation6], %s805_s13  ;;  %s573_s11 = scalar_lea.vmem %s829_s28, 128 }
  0x4c   : > { %v225_v8 = vsub.s32 0, %v224_v7  ;;  %v229_v9 = vsub.s32 4, %v224_v7  ;;  %v251_v10 = vsub.s32 1, %v224_v7  ;;  %v255_v11 = vsub.s32 5, %v224_v7  ;;  %p574_p13 = scmp.ne.s32.totalorder %s829_s28, %s573_s11  ;;  %p889_p0 = scmp.ne.s32.totalorder %s884_s6, 0 }
  0x4d   : > { %v277_v13 = vsub.s32 2, %v224_v7  ;;  %v281_v14 = vsub.s32 6, %v224_v7  ;;  %v303_v15 = vsub.s32 3, %v224_v7  ;;  %v307_v16 = vsub.s32 7, %v224_v7  ;;  %s665_s22 = smov [#allocation7]  }
  0x4e   : > { %525 = vset.pattern.permute.xlu0 %v663_v3  ;;  %527 = vset.pattern.permute.xlu1 %v664_v4  ;;  %v226_v17 = vrot.slane %v216_v12, %v225_v8  ;;  %v230_v18 = vrot.slane %v216_v12, %v229_v9  ;;  %v252_v19 = vrot.slane %v216_v12, %v251_v10  ;;  %p575_p2 = pnand %p574_p13, %p889_p0  ;;  %s577_s12 = sshll.u32 %s665_s22, 4  ;;  %s578_s12 = int_to_ptr.vmem [resolvable:$false] %s577_s12 }
  0x4f   : > { %246 = vperm.xlu0 %525, %v214_v2   ;;  %298 = vperm.xlu1 %527, %v214_v2   ;;  %v256_v20 = vrot.slane %v216_v12, %v255_v11  ;;  %v278_v21 = vrot.slane %v216_v12, %v277_v13  ;;  %v282_v22 = vrot.slane %v216_v12, %v281_v14  ;;  %s579_s15 = scalar_lea.vmem %s578_s12, 256  ;;  %p580_p12 = scmp.lt.s32.totalorder %s829_s28, %s578_s12 }
  0x50   : > { %v304_v25 = vrot.slane %v216_v12, %v303_v15  ;;  %v308_v26 = vrot.slane %v216_v12, %v307_v16  ;;  %v236_v27 = vrot.slane %v226_v17, %v225_v8  ;;  %v240_v28 = vrot.slane %v230_v18, %v225_v8  ;;  %p576_p5 = pneg %p575_p2  ;;  %p581_p4 = scmp.lt.s32.totalorder %s579_s15, %s573_s11 }
  0x51   : > { %v262_v29 = vrot.slane %v252_v19, %v251_v10  ;;  %v266_v30 = vrot.slane %v256_v20, %v251_v10  ;;  %v288_v31 = vrot.slane %v278_v21, %v277_v13  ;;  %v292_v32 = vrot.slane %v282_v22, %v277_v13 }
  0x52   : > { %v314_v33 = vrot.slane %v304_v25, %v303_v15  ;;  %v318_v34 = vrot.slane %v308_v26, %v303_v15  ;;  %p582_p8 = por %p581_p4, %p580_p12 }
  0x53   : > { %528 = vset.pattern.permute.xlu1 %v661_v0  ;;  %529 = vset.pattern.permute.xlu0 %v661_v0 }
  0x54   : > { %325 = vperm.xlu1 %528, %v215_v5   ;;  %p583_p11 = pnand %p582_p8, %p576_p5 }
  0xc9   : > { %v220_v23 = vpop.permute.xlu0 %219  ;;  %v273_v24 = vpop.permute.xlu1 %272 }
  0xca   : > { %v241_v37 = vmul.f32 %v236_v27, %v220_v23  ;;  %v242_v38 = vmul.f32 %v240_v28, %v220_v23  ;;  %v293_v41 = vmul.f32 %v288_v31, %v273_v24  ;;  %v294_v42 = vmul.f32 %v292_v32, %v273_v24 }
  0xce   : > { %v247_v35 = vpop.permute.xlu0 %246  ;;  %v299_v36 = vpop.permute.xlu1 %298 }
  0xcf   : > { %v267_v39 = vmul.f32 %v262_v29, %v247_v35  ;;  %v268_v40 = vmul.f32 %v266_v30, %v247_v35  ;;  %v319_v45 = vmul.f32 %v314_v33, %v299_v36  ;;  %v320_v46 = vmul.f32 %v318_v34, %v299_v36 }
  0xd1   : > { %v269_v43 = vadd.f32 %v267_v39, %v241_v37  ;;  %v270_v44 = vadd.f32 %v268_v40, %v242_v38 }
  0xd3   : > { %v295_v47 = vadd.f32 %v293_v41, %v269_v43  ;;  %v296_v48 = vadd.f32 %v294_v42, %v270_v44  ;;  %v326_v49 = vpop.permute.xlu1 %325 }
  0xd5   : > { %v321_v51 = vadd.f32 %v319_v45, %v295_v47  ;;  %v322_v52 = vadd.f32 %v320_v46, %v296_v48 }
  0xd7   : > { %v328_v53 = vadd.f32 %v326_v49, %v321_v51  ;;  %v329_v54 = vadd.f32 %v326_v49, %v322_v52 }
  0xd9   : > { %v332_v55 = vadd.f32 %v328_v53, %v216_v12  ;;  %v333_v56 = vadd.f32 %v330_v50, %v329_v54 }
  0xdb   : > { %v336_v57 = vcombine.low %v332_v55, %v333_v56 }
  0xdd   : > { %338 = vst [vmem:[%s211_s26] sm:$0xff] %v336_v57 }
  0xde   : > { %586 = shalt.err (!%p583_p11)
}
  0xdf   : > { %s587_s13 = scalar_lea.hbm %s827_s9, 128  ;;  %s591_s14 = scalar_lea.hbm %s880_s4, 256 }
  0xe0   : > { %p588_p9 = scmp.ne.s32.totalorder %s827_s9, %s587_s13  ;;  %p592_p6 = scmp.lt.u32.totalorder %s827_s9, %s880_s4 }
  0xe1   : > { %p593_p7 = scmp.lt.u32.totalorder %s591_s14, %s587_s13  ;;  %p595_p13 = scmp.lt.u32.totalorder %s587_s13, %s827_s9 }
  0xe2   : > { %p589_p1 = pnand %p588_p9, %p889_p0 }
  0xe3   : > { %p594_p10 = por %p593_p7, %p592_p6 }
  0xe4   : > { %p590_p3 = pneg %p589_p1 }
  0xe5   : > { %p596_p2 = por %p595_p13, %p594_p10 }
  0xe7   : > { %p597_p5 = pnand %p596_p2, %p590_p3 }
  0xe9   : > { %600 = shalt.err (!%p597_p5)
}
  0xea   : > { %459 = dma.vmem_to_hbm [thread:$0]  (%p889_p0), %s829_s28, 128, %s827_s9, %s340_s10  }
  0xeb PF: > { %s368_s25 = sand.u32 1, %s637_s20   ;;  %p890_p12 = scmp.ne.s32.totalorder %s885_s8, 0 }
  0xec   : > { %p891_p4 = scmp.ge.s32.totalorder %s657_s24, 2  ;;  %s369_s5 = scalar_lea.sflag [#allocation6], %s368_s25 }
  0xee   : > { %p466_p8 = pnand %p891_p4, %p890_p12 }
  0xf0   : > { %632 = dma.done.wait (!%p466_p8), %s369_s5, 128  }
  0xf1   : > { %634 = vsyncadd (!%p466_p8), %s369_s5, 4294967168  ;;  %s26_s24 = sadd.s32 1, %s657_s24   ;;  %s892_s20 = smov %s641_s0 }
  0xf2   : > { %p23_p11 = scmp.ge.s32.totalorder %s26_s24, 4   ;;  %s893_s0 = smov %s645_s21 }
  0xf3   : > { %s894_s21 = smov %s750_s7  ;;  %s895_s22 = smov %s653_s23 }
  0xf4   : > { %s896_s23 = smov %s898_s27  ;;  %25 = sbr.rel (!%p23_p11) target bundleno = 21 (0x15), region = 77 }
  0xfb   :  { %374 = vsyncpa [#allocation5], 1 }
  0xfc   :  { %376 = vsyncpa [#allocation5 + $0x1], 1 }
  0xfd   :  { %377 = vsyncpa [#allocation6], 1 }
  0xfe   :  { %379 = vsyncpa [#allocation6 + $0x1], 1 }

</bundles_post_ra>
